<compile_context>
chip_gen: v6e
topology: v6e:2x2x1
jax: 0.10.0
libtpu: 0.0.40
codegen_flags: <defaults>
</compile_context>

<pallas_src>
import functools

import jax
import jax.numpy as jnp
from jax.experimental import pallas as pl
from jax.experimental.pallas import tpu as pltpu

HIDDEN = 64
LANE = 128


def _round_up(n, m):
    return ((n + m - 1) // m) * m


def vae_forward_kernel(xin_ref, hslab_ref, wslab_ref, out_ref, *,
                       input_dim, latent_dim, hidden):
    """One batch tile of the VAE forward; constants are VMEM-resident slabs."""
    f32 = jnp.float32
    D, L, H = input_dim, latent_dim, hidden
    tb = xin_ref.shape[0]
    out_w = out_ref.shape[1]

    # -------- single fused input tile [x | eps] --------
    xin = xin_ref[...].astype(f32)                 # (TB, D+L)
    x = xin[:, :D]
    eps = xin[:, D:D + L]

    # -------- unpack VMEM-resident constant slabs (static slices) --------
    w1 = hslab_ref[0:D, :]                         # (D, H)
    b1 = hslab_ref[D:D + 1, :]                     # (1, H)
    w3 = hslab_ref[D + 1:D + 1 + L, :]             # (L, H)
    b3 = hslab_ref[D + 1 + L:D + 2 + L, :]         # (1, H)
    w2 = wslab_ref[0:H, 0:2 * L]                   # (H, 2L)
    b2 = wslab_ref[H:H + 1, 0:2 * L]               # (1, 2L)
    w4 = wslab_ref[H + 1:2 * H + 1, 0:D]           # (H, D)
    b4 = wslab_ref[2 * H + 1:2 * H + 2, 0:D]       # (1, D)

    # ---------------- encoder: Linear(D, 64) -> ReLU (f32 MXU) ----------------
    h = jnp.dot(x, w1, preferred_element_type=f32) + b1
    h = jnp.maximum(h, 0.0)

    # -------- encoder head: ONE fused Linear(64, 2L); lane-slice the result --------
    enc = jnp.dot(h, w2, preferred_element_type=f32) + b2      # (TB, 2L)
    z_mean = enc[:, :L]
    z_log_var = enc[:, L:]

    # ---------------- reparameterize (exp on the EUP) ----------------
    z = z_mean + jnp.exp(0.5 * z_log_var) * eps

    # ---------------- decoder: Linear(L, 64) -> ReLU ----------------
    if L <= 4:
        # K == latent_dim is tiny; broadcast FMAs on the VPU beat an MXU trip.
        h2 = jnp.broadcast_to(b3, (tb, H))
        for l in range(L):
            h2 = h2 + z[:, l:l + 1] * w3[l:l + 1, :]
    else:
        h2 = jnp.dot(z, w3, preferred_element_type=f32) + b3
    h2 = jnp.maximum(h2, 0.0)

    # ---------------- decoder: Linear(64, D) -> Sigmoid ----------------
    dec = jax.nn.sigmoid(jnp.dot(h2, w4, preferred_element_type=f32) + b4)

    # Lane-dense (multiple-of-128-wide) output slab
    #   [decoded | z_mean | z_log_var | zeros]
    # -> one unmasked store / one writeback DMA per grid step. Pad lanes are
    # written (zeros) every step so the wrapper never sees stale VMEM.
    pad_w = out_w - (D + 2 * L)
    pieces = [dec, z_mean, z_log_var]
    if pad_w:
        pieces.append(jnp.zeros((tb, pad_w), f32))
    out_ref[...] = jnp.concatenate(pieces, axis=1).astype(out_ref.dtype)


def pack_params(params):
    """Pack the 8 weight/bias tensors into two f32 constant slabs.

    hslab (width H):      [w1 (D rows); b1 (1); w3 (L); b3 (1)]
    wslab (width max(2L,D)): [w2; b2; w4; b4], lane-padded to common width.
    """
    w1, b1 = params["w1"], params["b1"]
    w2, b2 = params["w2"], params["b2"]
    w3, b3 = params["w3"], params["b3"]
    w4, b4 = params["w4"], params["b4"]
    D = w1.shape[0]
    L = w3.shape[0]
    hslab = jnp.concatenate([w1, b1, w3, b3], axis=0).astype(jnp.float32)
    wmax = max(2 * L, D)
    pad2 = wmax - 2 * L
    pad4 = wmax - D
    wslab = jnp.concatenate([
        jnp.pad(w2, ((0, 0), (0, pad2))),
        jnp.pad(b2, ((0, 0), (0, pad2))),
        jnp.pad(w4, ((0, 0), (0, pad4))),
        jnp.pad(b4, ((0, 0), (0, pad4))),
    ], axis=0).astype(jnp.float32)
    return hslab, wslab


def vae_forward(x, eps, params, *, block_b=1024):
    """x: (B, input_dim) f32, eps: (B, latent_dim) f32 (host-sampled N(0,1))."""
    B, D = x.shape
    L = eps.shape[1]
    H = params["w1"].shape[1]
    in_w = D + L
    out_w = _round_up(D + 2 * L, LANE)   # lane-dense output width

    # Batch tile: multiple of 8 sublanes, as large as block_b allows (amortize
    # the ~0.35 us/step grid overhead); keep >= 2 grid steps when the batch is
    # big enough so the ("parallel",) axis feeds both TensorCores on v7x.
    Bp8 = _round_up(B, 8)
    TB = min(block_b, Bp8)
    if Bp8 // TB < 2 and Bp8 >= 16:
        TB = _round_up((Bp8 + 1) // 2, 8)
    Bp = _round_up(B, TB)
    grid = (Bp // TB,)

    # Single fused input slab [x | eps] -> one input DMA per grid step.
    xin = jnp.concatenate([x, eps], axis=1)
    if Bp != B:
        xin = jnp.pad(xin, ((0, Bp - B), (0, 0)))

    # In production pack once at init; the concat here is a trivial XLA op.
    hslab, wslab = pack_params(params)

    kernel = functools.partial(vae_forward_kernel,
                               input_dim=D, latent_dim=L, hidden=H)

    def const_spec(a):
        # Constant block index -> fetched once, stays VMEM-resident.
        return pl.BlockSpec(a.shape, lambda i: (0, 0))

    # Rough double-buffered VMEM footprint; raise the scoped limit only when a
    # huge TB actually needs it (matters first on v7x's 32 MiB scoped default).
    per_step_bytes = 2 * TB * (in_w + out_w) * 4 + (hslab.size + wslab.size) * 4
    vmem_limit = int(per_step_bytes * 2) if per_step_bytes > (16 << 20) else None
    cp_kwargs = {"vmem_limit_bytes": vmem_limit} if vmem_limit else {}

    out = pl.pallas_call(
        kernel,
        out_shape=jax.ShapeDtypeStruct((Bp, out_w), jnp.float32),
        grid_spec=pltpu.PrefetchScalarGridSpec(
            num_scalar_prefetch=0,
            grid=grid,
            in_specs=[
                pl.BlockSpec((TB, in_w), lambda i: (i, 0)),   # [x | eps] tile
                const_spec(hslab),                            # [w1; b1; w3; b3]
                const_spec(wslab),                            # [w2; b2; w4; b4]
            ],
            # If a profile shows exposed DMA on very long grids, add
            # pipeline_mode=pl.Buffered(3) to the batch-tiled specs above/below.
            out_specs=pl.BlockSpec((TB, out_w), lambda i: (i, 0)),
        ),
        compiler_params=pltpu.CompilerParams(
            dimension_semantics=("parallel",),   # shard batch tiles over TCs (v7x)
            **cp_kwargs,
        ),
    )(xin, hslab, wslab)

    decoded = out[:B, :D]
    z_mean = out[:B, D:D + L]
    z_log_var = out[:B, D + L:D + 2 * L]
    return decoded, z_mean, z_log_var


def init_params(key, input_dim, latent_dim=2, hidden=HIDDEN):
    """PyTorch nn.Linear-style init; weights pre-transposed to (in, out), f32."""
    keys = jax.random.split(key, 8)

    def linear(kw, kb, fan_in, fan_out):
        bound = 1.0 / float(fan_in) ** 0.5
        w = jax.random.uniform(kw, (fan_in, fan_out), jnp.float32, -bound, bound)
        b = jax.random.uniform(kb, (1, fan_out), jnp.float32, -bound, bound)
        return w, b

    w1, b1 = linear(keys[0], keys[1], input_dim, hidden)
    w2, b2 = linear(keys[2], keys[3], hidden, latent_dim * 2)
    w3, b3 = linear(keys[4], keys[5], latent_dim, hidden)
    w4, b4 = linear(keys[6], keys[7], hidden, input_dim)
    return dict(w1=w1, b1=b1, w2=w2, b2=b2, w3=w3, b3=b3, w4=w4, b4=b4)


def vae_forward_ref(x, eps, p):
    """Pure-JAX f32 reference for correctness checking."""
    L = eps.shape[1]
    h = jnp.maximum(x @ p["w1"] + p["b1"], 0.0)
    enc = h @ p["w2"] + p["b2"]
    z_mean, z_log_var = enc[:, :L], enc[:, L:]
    z = z_mean + jnp.exp(0.5 * z_log_var) * eps
    h2 = jnp.maximum(z @ p["w3"] + p["b3"], 0.0)
    dec = jax.nn.sigmoid(h2 @ p["w4"] + p["b4"])
    return dec, z_mean, z_log_var


if __name__ == "__main__":
    key = jax.random.PRNGKey(0)
    k_x, k_eps, k_params = jax.random.split(key, 3)

    batch = 256          # split into 2 parallel grid steps of 128 rows
    input_dim = 16
    latent_dim = 2

    x = jax.random.normal(k_x, (batch, input_dim), jnp.float32)
    eps = jax.random.normal(k_eps, (batch, latent_dim), jnp.float32)
    params = init_params(k_params, input_dim, latent_dim)

    decoded, z_mean, z_log_var = vae_forward(x, eps, params)
    jax.block_until_ready((decoded, z_mean, z_log_var))

    dec_ref, mean_ref, logvar_ref = vae_forward_ref(x, eps, params)
    assert decoded.shape == (batch, input_dim)
    assert z_mean.shape == (batch, latent_dim)
    assert z_log_var.shape == (batch, latent_dim)
    # f32 operands throughout; tolerance covers the TPU MXU's default-precision
    # handling of f32 dots (much tighter than the previous bf16-operand version).
    assert jnp.allclose(decoded, dec_ref, atol=1e-2, rtol=1e-2)
    assert jnp.allclose(z_mean, mean_ref, atol=1e-2, rtol=1e-2)
    assert jnp.allclose(z_log_var, logvar_ref, atol=1e-2, rtol=1e-2)

    print("KERNEL_OK")
</pallas_src>

<mosaic_0001>
module attributes {stable_mosaic.version = 11 : i64} {
  func.func @vae_forward_kernel(%arg0: i32, %arg1: memref<128x18xf32, #tpu.memory_space<vmem>>, %arg2: memref<20x64xf32, #tpu.memory_space<vmem>>, %arg3: memref<130x16xf32, #tpu.memory_space<vmem>>, %arg4: memref<128x128xf32, #tpu.memory_space<vmem>>) attributes {dimension_semantics = [#tpu.dimension_semantics<parallel>], iteration_bounds = array<i64: 2>, scalar_prefetch = 0 : i64, scratch_operands = 0 : i64, tpu.core_type = #tpu.core_type<tc>, window_params = [{transform_indices = @transform_0, window_bounds = array<i64: 128, 18>}, {pipeline_mode = #tpu.pipeline_mode<synchronous>, transform_indices = @transform_1, window_bounds = array<i64: 20, 64>}, {pipeline_mode = #tpu.pipeline_mode<synchronous>, transform_indices = @transform_2, window_bounds = array<i64: 130, 16>}, {transform_indices = @transform_3, window_bounds = array<i64: 128, 128>}]} {
    %c0 = arith.constant 0 : index
    %c0_0 = arith.constant 0 : index
    %0 = vector.load %arg1[%c0, %c0_0] : memref<128x18xf32, #tpu.memory_space<vmem>>, vector<128x18xf32>
    %1 = vector.extract_strided_slice %0 {offsets = [0, 0], sizes = [128, 16], strides = [1, 1]} : vector<128x18xf32> to vector<128x16xf32>
    %2 = vector.extract_strided_slice %0 {offsets = [0, 16], sizes = [128, 2], strides = [1, 1]} : vector<128x18xf32> to vector<128x2xf32>
    %c0_1 = arith.constant 0 : index
    %c0_2 = arith.constant 0 : index
    %3 = vector.load %arg2[%c0_1, %c0_2] : memref<20x64xf32, #tpu.memory_space<vmem>>, vector<16x64xf32>
    %c16 = arith.constant 16 : index
    %c0_3 = arith.constant 0 : index
    %4 = vector.load %arg2[%c16, %c0_3] : memref<20x64xf32, #tpu.memory_space<vmem>>, vector<1x64xf32>
    %c17 = arith.constant 17 : index
    %c0_4 = arith.constant 0 : index
    %5 = vector.load %arg2[%c17, %c0_4] : memref<20x64xf32, #tpu.memory_space<vmem>>, vector<2x64xf32>
    %c19 = arith.constant 19 : index
    %c0_5 = arith.constant 0 : index
    %6 = vector.load %arg2[%c19, %c0_5] : memref<20x64xf32, #tpu.memory_space<vmem>>, vector<1x64xf32>
    %c0_6 = arith.constant 0 : index
    %c0_7 = arith.constant 0 : index
    %7 = vector.load %arg3[%c0_6, %c0_7] : memref<130x16xf32, #tpu.memory_space<vmem>>, vector<64x4xf32>
    %c64 = arith.constant 64 : index
    %c0_8 = arith.constant 0 : index
    %8 = vector.load %arg3[%c64, %c0_8] : memref<130x16xf32, #tpu.memory_space<vmem>>, vector<1x4xf32>
    %c65 = arith.constant 65 : index
    %c0_9 = arith.constant 0 : index
    %9 = vector.load %arg3[%c65, %c0_9] : memref<130x16xf32, #tpu.memory_space<vmem>>, vector<64x16xf32>
    %c129 = arith.constant 129 : index
    %c0_10 = arith.constant 0 : index
    %10 = vector.load %arg3[%c129, %c0_10] : memref<130x16xf32, #tpu.memory_space<vmem>>, vector<1x16xf32>
    %cst = arith.constant dense<0.000000e+00> : vector<128x64xf32>
    %11 = tpu.matmul %1, %3, %cst {dimension_numbers = #tpu.dot_dimension_numbers<[1], [0], [0], [1], [0, 0, 1, 1], [], []>} : vector<128x16xf32>, vector<16x64xf32>, vector<128x64xf32> -> vector<128x64xf32>
    %12 = vector.broadcast %4 : vector<1x64xf32> to vector<128x64xf32>
    %13 = arith.addf %11, %12 : vector<128x64xf32>
    %cst_11 = arith.constant 0.000000e+00 : f32
    %14 = vector.broadcast %cst_11 : f32 to vector<128x64xf32>
    %15 = arith.maximumf %13, %14 : vector<128x64xf32>
    %cst_12 = arith.constant dense<0.000000e+00> : vector<128x4xf32>
    %16 = tpu.matmul %15, %7, %cst_12 {dimension_numbers = #tpu.dot_dimension_numbers<[1], [0], [0], [1], [0, 0, 1, 1], [], []>} : vector<128x64xf32>, vector<64x4xf32>, vector<128x4xf32> -> vector<128x4xf32>
    %17 = vector.broadcast %8 : vector<1x4xf32> to vector<128x4xf32>
    %18 = arith.addf %16, %17 : vector<128x4xf32>
    %19 = vector.extract_strided_slice %18 {offsets = [0, 0], sizes = [128, 2], strides = [1, 1]} : vector<128x4xf32> to vector<128x2xf32>
    %20 = vector.extract_strided_slice %18 {offsets = [0, 2], sizes = [128, 2], strides = [1, 1]} : vector<128x4xf32> to vector<128x2xf32>
    %cst_13 = arith.constant 5.000000e-01 : f32
    %21 = vector.broadcast %cst_13 : f32 to vector<128x2xf32>
    %22 = arith.mulf %21, %20 : vector<128x2xf32>
    %23 = math.exp %22 : vector<128x2xf32>
    %24 = arith.mulf %23, %2 : vector<128x2xf32>
    %25 = arith.addf %19, %24 : vector<128x2xf32>
    %26 = vector.shape_cast %6 : vector<1x64xf32> to vector<1x64xf32>
    %27 = vector.broadcast %26 : vector<1x64xf32> to vector<128x64xf32>
    %28 = vector.extract_strided_slice %25 {offsets = [0, 0], sizes = [128, 1], strides = [1, 1]} : vector<128x2xf32> to vector<128x1xf32>
    %29 = vector.extract_strided_slice %5 {offsets = [0, 0], sizes = [1, 64], strides = [1, 1]} : vector<2x64xf32> to vector<1x64xf32>
    %30 = vector.broadcast %28 : vector<128x1xf32> to vector<128x64xf32>
    %31 = vector.broadcast %29 : vector<1x64xf32> to vector<128x64xf32>
    %32 = arith.mulf %30, %31 : vector<128x64xf32>
    %33 = arith.addf %27, %32 : vector<128x64xf32>
    %34 = vector.extract_strided_slice %25 {offsets = [0, 1], sizes = [128, 1], strides = [1, 1]} : vector<128x2xf32> to vector<128x1xf32>
    %35 = vector.extract_strided_slice %5 {offsets = [1, 0], sizes = [1, 64], strides = [1, 1]} : vector<2x64xf32> to vector<1x64xf32>
    %36 = vector.broadcast %34 : vector<128x1xf32> to vector<128x64xf32>
    %37 = vector.broadcast %35 : vector<1x64xf32> to vector<128x64xf32>
    %38 = arith.mulf %36, %37 : vector<128x64xf32>
    %39 = arith.addf %33, %38 : vector<128x64xf32>
    %cst_14 = arith.constant 0.000000e+00 : f32
    %40 = vector.broadcast %cst_14 : f32 to vector<128x64xf32>
    %41 = arith.maximumf %39, %40 : vector<128x64xf32>
    %cst_15 = arith.constant dense<0.000000e+00> : vector<128x16xf32>
    %42 = tpu.matmul %41, %9, %cst_15 {dimension_numbers = #tpu.dot_dimension_numbers<[1], [0], [0], [1], [0, 0, 1, 1], [], []>} : vector<128x64xf32>, vector<64x16xf32>, vector<128x16xf32> -> vector<128x16xf32>
    %43 = vector.broadcast %10 : vector<1x16xf32> to vector<128x16xf32>
    %44 = arith.addf %42, %43 : vector<128x16xf32>
    %45 = arith.negf %44 : vector<128x16xf32>
    %46 = math.exp %45 : vector<128x16xf32>
    %cst_16 = arith.constant 1.000000e+00 : f32
    %47 = vector.broadcast %cst_16 : f32 to vector<128x16xf32>
    %48 = arith.addf %47, %46 : vector<128x16xf32>
    %49 = arith.divf %47, %48 : vector<128x16xf32>
    %cst_17 = arith.constant 0.000000e+00 : f32
    %50 = vector.broadcast %cst_17 : f32 to vector<128x108xf32>
    %51 = tpu.concatenate %49, %19, %20, %50 in 1 : vector<128x16xf32>, vector<128x2xf32>, vector<128x2xf32>, vector<128x108xf32> -> vector<128x128xf32>
    %c0_18 = arith.constant 0 : index
    %c0_19 = arith.constant 0 : index
    %52 = vector.load %arg4[%c0_18, %c0_19] : memref<128x128xf32, #tpu.memory_space<vmem>>, vector<128x128xf32>
    tpu.vector_store %arg4[%c0_18, %c0_19], %51 {strides = array<i32>} : memref<128x128xf32, #tpu.memory_space<vmem>>, vector<128x128xf32>,
    return
  }
  func.func @transform_0(%arg0: i32) -> (i32, i32) {
    %c0_i32 = arith.constant 0 : i32
    %c0_i32_0 = arith.constant 0 : i32
    return %arg0, %c0_i32 : i32, i32
  }
  func.func @transform_1(%arg0: i32) -> (i32, i32) {
    %c0_i32 = arith.constant 0 : i32
    %c0_i32_0 = arith.constant 0 : i32
    %c0_i32_1 = arith.constant 0 : i32
    return %c0_i32, %c0_i32_0 : i32, i32
  }
  func.func @transform_2(%arg0: i32) -> (i32, i32) {
    %c0_i32 = arith.constant 0 : i32
    %c0_i32_0 = arith.constant 0 : i32
    %c0_i32_1 = arith.constant 0 : i32
    return %c0_i32, %c0_i32_0 : i32, i32
  }
  func.func @transform_3(%arg0: i32) -> (i32, i32) {
    %c0_i32 = arith.constant 0 : i32
    %c0_i32_0 = arith.constant 0 : i32
    return %arg0, %c0_i32 : i32, i32
  }
}

</mosaic_0001>

<bundles_post_ra>
// kernel: tpu_custom_call.1
= control target key start
LH: loop header
LB: loop body
LE: loop exit
PB: predicated region body
PF: predicated region fallthrough
CT: control target
= control target key end

     0   :  { %8 = vsyncpa [#allocation3], 0  ;;  %s2603_s0 = inlined_call_operand.vmem [shape: f32[256,18], index: 0, kind: input, shape index: {}]   ;;  %s2604_s1 = inlined_call_operand.vmem [shape: f32[20,64], index: 1, kind: input, shape index: {}]   ;;  %s2605_s2 = inlined_call_operand.vmem [shape: f32[130,16], index: 2, kind: input, shape index: {}]   ;;  %s2606_s3 = inlined_call_operand.hbm [shape: f32[256,128], index: 3, kind: output, shape index: {}]  }
   0x1   :  { %10 = vsyncpa [#allocation3 + $0x1], 0  ;;  %s2066_s12 = smov 0   ;;  %s2068_s13 = smov 0  }
   0x2   :  { %s2070_s14 = smov 0   ;;  %s2072_s15 = smov 0  }
   0x3 LB: > { %s2087_s16 = sadd.s32 4294967295, %s2036_s15   ;;  %s1550_s17 = sadd.s32 4294967294, %s2036_s15   ;;  %s2036_s15 = sphi %s2072_s15, %s2612_s15   ;;  %s2032_s14 = sphi %s2070_s14, %s2611_s14   ;;  %s2028_s13 = sphi %s2068_s13, %s2610_s13   ;;  %s2024_s12 = sphi %s2066_s12, %s2609_s12  }
   0x4   : > { %s2091_s18 = sadd.s32 1, %s2036_s15   ;;  %s91_s19 = sadd.s32 1, %s2032_s14 }
   0x5   : > { %s88_s20 = ssub.s32 %s2036_s15, %s2091_s18  ;;  %p101_p0 = scmp.ne.s32.totalorder %s2032_s14, %s2028_s13 }
   0x6   : > { %p89_p1 = scmp.eq.s32.totalorder %s88_s20, 0  ;;  %p102_p2 = scmp.eq.s32.totalorder %s2087_s16, 1 }
   0x7   : > { %p107_p3 = scmp.ne.s32.totalorder %s2028_s13, %s2024_s12  ;;  %p108_p4 = scmp.eq.s32.totalorder %s1550_s17, 1 }
   0x8   : > { %s2102_s21 = scalar_select %p89_p1, %s2032_s14, %s91_s19  }
   0x9   : > { %p2104_p5 = por %p102_p2, %p101_p0  ;;  %p2108_p6 = por %p108_p4, %p107_p3 }
   0xa   : > { %p1553_p7 = scmp.ge.s32.totalorder %s2036_s15, 1  ;;  %p141_p8 = scmp.lt.s32.totalorder %s2036_s15, 3 }
   0xc   : > { %p142_p9 = pnand %p1553_p7, %p141_p8 }
   0xd   : > { %s1555_s28 = sshll.u32 (!%p142_p9), %s2087_s16, 4  ;;  %s2041_s9 = smov (!%p142_p9), 126  }
   0xe   : > { %145 = sbr.rel (%p142_p9) target bundleno = 1024 (0x400), region = 32  ;;  %p166_p10 = scmp.lt.s32.totalorder (!%p142_p9), %s1555_s28, 31 }
   0xf   : > { %s2042_s8 = smov (!%p142_p9), 16   ;;  %s162_s24 = sand.u32 (!%p142_p9), 1, %s2028_s13  }
  0x10   : > { %s1554_s25 = sshll.u32 (!%p142_p9), %s162_s24, 7  ;;  %s1630_s27 = sshll.u32 (!%p142_p9), %s2087_s16, 11 }
  0x11   : > { %s2480_s26 = scalar_lea.vmem (!%p142_p9), [#allocation2], %s1554_s25  ;;  %s2563_s16 = scalar_lea.sflag (!%p142_p9), [#allocation3], %s162_s24 }
  0x12   : > { %s2043_s6 = smov (!%p142_p9), [#allocation2]  }
  0x13   : > { %v189_v0 = vld [vmem:[%s2604_s1 + $0x8] sm:$0xff]  ;;  %v188_v1 = vld [vmem:[%s2604_s1] sm:$0xff]  ;;  %v200_v2 = vld [vmem:[%s2605_s2 + $0x38] sm:$0xff]  ;;  %s2614_s28 = smov (!%p166_p10, %s1555_s28), 31  ;;  %vm215_vm0 = vcmask 130048   ;;  %vm429_vm1 = vcmask 523264  }
  0x14   : > { %1697 = vmatprep.subr.mxu0 %v189_v0  ;;  %1805 = vmatprep.subr.mxu1 %v189_v0  ;;  %s1556_s4 = sshll.u32 %s2614_s28, 3  ;;  %v199_v7 = vld [vmem:[%s2605_s2 + $0x30] sm:$0xff]  ;;  %v198_v13 = vld [vmem:[%s2605_s2 + $0x28] sm:$0xff]  ;;  %v197_v16 = vld [vmem:[%s2605_s2 + $0x20] sm:$0xff]  ;;  %vm1424_vm2 = vcmask 146432   ;;  %vm1441_vm3 = vcmask 162816  }
  0x15   : > { %1698 = vmatpush3.msra.mxu0 %v189_v0  ;;  %1807 = vmatpush3.msra.mxu1 %v189_v0  ;;  %s2127_s7 = scalar_lea.vmem %s2603_s0, %s1556_s4  ;;  %v196_v19 = vld [vmem:[%s2605_s2 + $0x18] sm:$0xff]  ;;  %v195_v23 = vld [vmem:[%s2605_s2 + $0x10] sm:$0xff]  ;;  %v194_v24 = vld [vmem:[%s2605_s2 + $0x8] sm:$0xff]  ;;  %s2038_s4 = smov 114  }
  0x16   : > { %1699 = vmatprep.subr.mxu0 %v188_v1  ;;  %1806 = vmatprep.subr.mxu1 %v188_v1  ;;  %v172_v3 = vld [vmem:[%s2127_s7] sm:$0xff]  ;;  %v173_v4 = vld [vmem:[%s2127_s7 + $0x8] sm:$0xff]  ;;  %v174_v5 = vld [vmem:[%s2127_s7 + $0x10] sm:$0xff]  ;;  %s1488_s28 = sshll.u32 %s2480_s26, 4  ;;  %s2555_s28 = int_to_ptr.vmem [resolvable:$true] %s1488_s28 }
  0x17   : > { %1700 = vmatpush3.msra.mxu0 %v188_v1  ;;  %1808 = vmatpush3.msra.mxu1 %v188_v1  ;;  %v180_v6 = vld [vmem:[%s2127_s7 + $0x40] sm:$0xff]  ;;  %v175_v8 = vld [vmem:[%s2127_s7 + $0x18] sm:$0xff]  ;;  %v181_v9 = vld [vmem:[%s2127_s7 + $0x48] sm:$0xff]  ;;  %s1976_s5 = scalar_lea.vmem %s2555_s28, 2048 }
  0x18   : > { %1725 = vmatprep.subr.mxu1 %v200_v2  ;;  %1701 = vmatprep.mubr.msk.f32.mxu0 %vm215_vm0, %v172_v3  ;;  %v182_v10 = vld [vmem:[%s2127_s7 + $0x50] sm:$0xff]  ;;  %v176_v11 = vld [vmem:[%s2127_s7 + $0x20] sm:$0xff]  ;;  %v183_v12 = vld [vmem:[%s2127_s7 + $0x58] sm:$0xff]  ;;  %p1977_p11 = scmp.ne.s32.totalorder %s2555_s28, %s1976_s5 }
  0x19   : > { %1702 = vmatmul.mubr.msk.f32.vlgmr.msra.gmra.mxu0 %vm215_vm0, %v173_v4  ;;  %1713 = vmatprep.mubr.msk.f32.mxu1 %vm215_vm0, %v180_v6  ;;  %v184_v14 = vld [vmem:[%s2127_s7 + $0x60] sm:$0xff]  ;;  %v177_v15 = vld [vmem:[%s2127_s7 + $0x28] sm:$0xff]  ;;  %v178_v17 = vld [vmem:[%s2127_s7 + $0x30] sm:$0xff] }
  0x1a   : > { %1704 = vmatprep.mubr.msk.f32.mxu0 %vm215_vm0, %v174_v5  ;;  %1714 = vmatmul.mubr.msk.f32.vlgmr.msra.gmra.mxu1 %vm215_vm0, %v181_v9  ;;  %v185_v18 = vld [vmem:[%s2127_s7 + $0x68] sm:$0xff]  ;;  %v186_v20 = vld [vmem:[%s2127_s7 + $0x70] sm:$0xff]  ;;  %v179_v21 = vld [vmem:[%s2127_s7 + $0x38] sm:$0xff]  ;;  %p1978_p12 = pnand %p1977_p11, %p2104_p5 }
  0x1b   : > { %1716 = vmatprep.mubr.msk.f32.mxu1 %vm215_vm0, %v182_v10  ;;  %1726 = vmatpush3.msra.mxu1 %v200_v2  ;;  %v187_v22 = vld [vmem:[%s2127_s7 + $0x78] sm:$0xff]  ;;  %v193_v25 = vld [vmem:[%s2605_s2] sm:$0xff]  ;;  %v1557_v26 = vld [vmem:[%s2604_s1 + $0x10] ss:$0 sm:$0xff]  ;;  %s1980_s7 = sshll.u32 %s2043_s6, 4  ;;  %s1981_s7 = int_to_ptr.vmem [resolvable:$false] %s1980_s7 }
  0x1c   : > { %1727 = vmatprep.subr.mxu1 %v199_v7  ;;  %671 = vrot.lane.b32.xlu0 %v172_v3, %s2038_s4  ;;  %p1979_p13 = pneg %p1978_p12  ;;  %p1983_p0 = scmp.lt.s32.totalorder %s2555_s28, %s1981_s7 }
  0x1d   : > { %1705 = vmatmul.mubr.msk.f32.gmra.mxu0 %vm215_vm0, %v175_v8  ;;  %1728 = vmatpush3.msra.mxu1 %v199_v7 }
  0x1e   : > { %1707 = vmatprep.mubr.msk.f32.mxu0 %vm215_vm0, %v176_v11  ;;  %1717 = vmatmul.mubr.msk.f32.gmra.mxu1 %vm215_vm0, %v183_v12 }
  0x1f   : > { %1729 = vmatprep.subr.mxu1 %v198_v13  ;;  %1719 = vmatprep.mubr.msk.f32.mxu1 %vm215_vm0, %v184_v14 }
  0x20   : > { %1730 = vmatpush3.msra.mxu1 %v198_v13  ;;  %675 = vrot.lane.b32.xlu1 %v174_v5, %s2038_s4 }
  0x21   : > { %1708 = vmatmul.mubr.msk.f32.gmra.mxu0 %vm215_vm0, %v177_v15  ;;  %1731 = vmatprep.subr.mxu1 %v197_v16 }
  0x22   : > { %1710 = vmatprep.mubr.msk.f32.mxu0 %vm215_vm0, %v178_v17  ;;  %1732 = vmatpush3.msra.mxu1 %v197_v16 }
  0x23   : > { %1720 = vmatmul.mubr.msk.f32.gmra.mxu1 %vm215_vm0, %v185_v18  ;;  %1733 = vmatprep.subr.mxu1 %v196_v19 }
  0x24   : > { %1722 = vmatprep.mubr.msk.f32.mxu1 %vm215_vm0, %v186_v20  ;;  %1734 = vmatpush3.msra.mxu1 %v196_v19 }
  0x25   : > { %1711 = vmatmul.mubr.msk.f32.gmra.mxu0 %vm215_vm0, %v179_v21  ;;  %1735 = vmatprep.subr.mxu1 %v195_v23 }
  0x26   : > { %1736 = vmatpush3.msra.mxu1 %v195_v23  ;;  %673 = vrot.lane.b32.xlu0 %v173_v4, %s2038_s4 }
  0x27   : > { %1723 = vmatmul.mubr.msk.f32.gmra.mxu1 %vm215_vm0, %v187_v22  ;;  %1737 = vmatprep.subr.mxu1 %v194_v24 }
  0x28   : > { %1738 = vmatpush3.msra.mxu1 %v194_v24  ;;  %677 = vrot.lane.b32.xlu1 %v175_v8, %s2038_s4 }
  0x29   : > { %1739 = vmatprep.subr.mxu1 %v193_v25 }
  0x2a   : > { %1740 = vmatpush3.msra.mxu1 %v193_v25  ;;  %679 = vrot.lane.b32.xlu0 %v176_v11, %s2038_s4  ;;  %v2204_v11 = vld [vmem:[%s2605_s2 + $0x40] ss:$0 sm:$0xff] }
  0x2c   : > { %681 = vrot.lane.b32.xlu1 %v177_v15, %s2038_s4 }
  0x2e   : > { %683 = vrot.lane.b32.xlu0 %v178_v17, %s2038_s4 }
  0x30   : > { %685 = vrot.lane.b32.xlu1 %v179_v21, %s2038_s4 }
  0x32   : > { %687 = vrot.lane.b32.xlu0 %v180_v6, %s2038_s4 }
  0x34   : > { %689 = vrot.lane.b32.xlu1 %v181_v9, %s2038_s4 }
  0x36   : > { %691 = vrot.lane.b32.xlu0 %v182_v10, %s2038_s4 }
  0x38   : > { %693 = vrot.lane.b32.xlu1 %v183_v12, %s2038_s4 }
  0x3a   : > { %695 = vrot.lane.b32.xlu0 %v184_v14, %s2038_s4 }
  0x3c   : > { %697 = vrot.lane.b32.xlu1 %v185_v18, %s2038_s4 }
  0x3e   : > { %699 = vrot.lane.b32.xlu0 %v186_v20, %s2038_s4 }
  0x40   : > { %701 = vrot.lane.b32.xlu1 %v187_v22, %s2038_s4  ;;  %s2553_s4 = scalar_lea.hbm %s2606_s3, %s1630_s27 }
  0x92   : > { %v2217_v21 = vpop.permute.xlu1 %675 }
  0xd9   : > { %v1703_v27 = vpop.f32.mrf.mxu0 }
  0xda   : > { %v336_v28 = vadd.f32 %v1703_v27, %v1557_v26  ;;  %v1715_v30 = vpop.f32.mrf.mxu1  ;;  %v672_v27 = vpop.permute.xlu0 %671 }
  0xdb   : > { %v330_v29 = vpop.f32.mrf.mxu0  ;;  %v376_v57 = vadd.f32 %v1715_v30, %v1557_v26 }
  0xdc   : > { %v331_v31 = vadd.f32 %v1557_v26, %v330_v29  ;;  %v370_v33 = vpop.f32.mrf.mxu1  ;;  %v410_v36 = vmax.f32 %v336_v28, 0.0 }
  0xdd   : > { %v1706_v32 = vpop.f32.mrf.mxu0  ;;  %v371_v52 = vadd.f32 %v1557_v26, %v370_v33  ;;  %v418_v62 = vmax.f32 %v376_v57, 0.0 }
  0xde   : > { %v409_v34 = vmax.f32 %v331_v31, 0.0  ;;  %v346_v35 = vadd.f32 %v1706_v32, %v1557_v26  ;;  %v1718_v38 = vpop.f32.mrf.mxu1 }
  0xdf   : > { %v340_v37 = vpop.f32.mrf.mxu0  ;;  %v417_v59 = vmax.f32 %v371_v52, 0.0  ;;  %v386_v63 = vadd.f32 %v1718_v38, %v1557_v26 }
  0xe0   : > { %v341_v39 = vadd.f32 %v1557_v26, %v340_v37  ;;  %1741 = vmatprep.mubr.msk.f32.mxu1 %vm429_vm1, %v409_v34  ;;  %v412_v40 = vmax.f32 %v346_v35, 0.0  ;;  %v380_v42 = vpop.f32.mrf.mxu1  ;;  %v678_v35 = vpop.permute.xlu1 %677  ;;  %v2040_v37 = vmov 0  }
  0xe1   : > { %v1709_v41 = vpop.f32.mrf.mxu0  ;;  %1742 = vmatmul.mubr.msk.f32.vlgmr.msra.gmra.mxu1 %vm429_vm1, %v410_v36  ;;  %v381_v60 = vadd.f32 %v1557_v26, %v380_v42  ;;  %v420_v3 = vmax.f32 %v386_v63, 0.0  ;;  %v2039_v36 = vmov 1   ;;  %1855 = vset.pattern.permute.xlu1 %v2040_v37 }
  0xe2   : > { %v411_v43 = vmax.f32 %v341_v39, 0.0  ;;  %v356_v44 = vadd.f32 %v1709_v41, %v1557_v26  ;;  %1856 = vset.pattern.permute.xlu0 %v2039_v36 }
  0xe3   : > { %v350_v45 = vpop.f32.mrf.mxu0  ;;  %v1721_v46 = vpop.f32.mrf.mxu1  ;;  %v419_v0 = vmax.f32 %v381_v60, 0.0 }
  0xe4   : > { %v351_v47 = vadd.f32 %v1557_v26, %v350_v45  ;;  %1744 = vmatprep.mubr.msk.f32.mxu1 %vm429_vm1, %v411_v43  ;;  %v414_v48 = vmax.f32 %v356_v44, 0.0  ;;  %v396_v4 = vadd.f32 %v1721_v46, %v1557_v26  ;;  %v674_v43 = vpop.permute.xlu0 %673 }
  0xe5   : > { %v1712_v49 = vpop.f32.mrf.mxu0  ;;  %1745 = vmatmul.mubr.msk.f32.gmra.mxu1 %vm429_vm1, %v412_v40  ;;  %v390_v54 = vpop.f32.mrf.mxu1 }
  0xe6   : > { %v413_v50 = vmax.f32 %v351_v47, 0.0  ;;  %v366_v51 = vadd.f32 %v1712_v49, %v1557_v26  ;;  %v391_v1 = vadd.f32 %v1557_v26, %v390_v54  ;;  %v422_v7 = vmax.f32 %v396_v4, 0.0 }
  0xe7   : > { %v360_v53 = vpop.f32.mrf.mxu0  ;;  %v1724_v61 = vpop.f32.mrf.mxu1 }
  0xe8   : > { %v361_v55 = vadd.f32 %v1557_v26, %v360_v53  ;;  %1747 = vmatprep.mubr.msk.f32.mxu1 %vm429_vm1, %v413_v50  ;;  %v416_v56 = vmax.f32 %v366_v51, 0.0  ;;  %v421_v5 = vmax.f32 %v391_v1, 0.0  ;;  %v406_v8 = vadd.f32 %v1724_v61, %v1557_v26  ;;  %v682_v51 = vpop.permute.xlu1 %681  ;;  %v680_v53 = vpop.permute.xlu0 %679 }
  0xe9   : > { %1748 = vmatmul.mubr.msk.f32.gmra.mxu1 %vm429_vm1, %v414_v48  ;;  %v400_v2 = vpop.f32.mrf.mxu1 }
  0xea   : > { %v415_v58 = vmax.f32 %v361_v55, 0.0  ;;  %v401_v6 = vadd.f32 %v1557_v26, %v400_v2  ;;  %v424_v10 = vmax.f32 %v406_v8, 0.0 }
  0xec   : > { %1750 = vmatprep.mubr.msk.f32.mxu1 %vm429_vm1, %v415_v58  ;;  %v423_v9 = vmax.f32 %v401_v6, 0.0  ;;  %v686_v4 = vpop.permute.xlu1 %685  ;;  %v684_v8 = vpop.permute.xlu0 %683 }
  0xed   : > { %1751 = vmatmul.mubr.msk.f32.gmra.mxu1 %vm429_vm1, %v416_v56 }
  0xee   : > { %1753 = vmatprep.mubr.msk.f32.mxu1 %vm429_vm1, %v417_v59 }
  0xf1   : > { %1754 = vmatmul.mubr.msk.f32.gmra.mxu1 %vm429_vm1, %v418_v62 }
  0xf2   : > { %1756 = vmatprep.mubr.msk.f32.mxu1 %vm429_vm1, %v419_v0 }
  0xf5   : > { %1757 = vmatmul.mubr.msk.f32.gmra.mxu1 %vm429_vm1, %v420_v3 }
  0xf6   : > { %1759 = vmatprep.mubr.msk.f32.mxu1 %vm429_vm1, %v421_v5 }
  0xf9   : > { %1760 = vmatmul.mubr.msk.f32.gmra.mxu1 %vm429_vm1, %v422_v7 }
  0xfa   : > { %1762 = vmatprep.mubr.msk.f32.mxu1 %vm429_vm1, %v423_v9 }
  0xfd   : > { %1763 = vmatmul.mubr.msk.f32.gmra.mxu1 %vm429_vm1, %v424_v10 }
 0x1a1   : > { %v1743_v12 = vpop.f32.mrf.mxu1 }
 0x1a2   : > { %v2207_v13 = vadd.f32 %v1743_v12, %v2204_v11 }
 0x1a3   : > { %v544_v14 = vpop.f32.mrf.mxu1 }
 0x1a4   : > { %v624_v15 = vmul.f32 0.5, %v2207_v13  ;;  %v2211_v16 = vadd.f32 %v2204_v11, %v544_v14 }
 0x1a5   : > { %v1746_v17 = vpop.f32.mrf.mxu1 }
 0x1a6   : > { %v641_v18 = vmul.f32 1.442695, %v624_v15  ;;  %v623_v19 = vmul.f32 0.5, %v2211_v16  ;;  %v2215_v20 = vadd.f32 %v1746_v17, %v2204_v11 }
 0x1a7   : > { %v554_v22 = vpop.f32.mrf.mxu1 }
 0x1a8   : > { %1880 = vpow2.f32 %v641_v18  ;;  %v639_v23 = vmul.f32 1.442695, %v623_v19  ;;  %v626_v24 = vmul.f32 0.5, %v2215_v20  ;;  %v2221_v25 = vadd.f32 %v2204_v11, %v554_v22 }
 0x1a9   : > { %v1749_v26 = vpop.f32.mrf.mxu1 }
 0x1aa   : > { %1882 = vpow2.f32 %v639_v23  ;;  %v645_v28 = vmul.f32 1.442695, %v626_v24  ;;  %v625_v29 = vmul.f32 0.5, %v2221_v25  ;;  %v2225_v30 = vadd.f32 %v1749_v26, %v2204_v11 }
 0x1ab   : > { %v564_v31 = vpop.f32.mrf.mxu1 }
 0x1ac   : > { %1884 = vpow2.f32 %v645_v28  ;;  %v643_v32 = vmul.f32 1.442695, %v625_v29  ;;  %v628_v33 = vmul.f32 0.5, %v2225_v30  ;;  %v2229_v34 = vadd.f32 %v2204_v11, %v564_v31  ;;  %v690_v31 = vpop.permute.xlu1 %689 }
 0x1ad   : > { %v1752_v38 = vpop.f32.mrf.mxu1 }
 0x1ae   : > { %1886 = vpow2.f32 %v643_v32  ;;  %v649_v39 = vmul.f32 1.442695, %v628_v33  ;;  %v627_v40 = vmul.f32 0.5, %v2229_v34  ;;  %v2235_v41 = vadd.f32 %v1752_v38, %v2204_v11 }
 0x1af   : > { %v574_v42 = vpop.f32.mrf.mxu1 }
 0x1b0   : > { %1888 = vpow2.f32 %v649_v39  ;;  %v647_v44 = vmul.f32 1.442695, %v627_v40  ;;  %v630_v45 = vmul.f32 0.5, %v2235_v41  ;;  %v2239_v46 = vadd.f32 %v2204_v11, %v574_v42 }
 0x1b1   : > { %v1755_v47 = vpop.f32.mrf.mxu1 }
 0x1b2   : > { %1890 = vpow2.f32 %v647_v44  ;;  %v653_v48 = vmul.f32 1.442695, %v630_v45  ;;  %v629_v49 = vmul.f32 0.5, %v2239_v46  ;;  %v2243_v50 = vadd.f32 %v1755_v47, %v2204_v11 }
 0x1b3   : > { %v584_v52 = vpop.f32.mrf.mxu1 }
 0x1b4   : > { %1892 = vpow2.f32 %v653_v48  ;;  %v651_v54 = vmul.f32 1.442695, %v629_v49  ;;  %v632_v55 = vmul.f32 0.5, %v2243_v50  ;;  %v2247_v56 = vadd.f32 %v2204_v11, %v584_v52  ;;  %v694_v52 = vpop.permute.xlu1 %693 }
 0x1b5   : > { %v1881_v57 = vpop.eup %1880  ;;  %v1758_v58 = vpop.f32.mrf.mxu1 }
 0x1b6   : > { %1894 = vpow2.f32 %v651_v54  ;;  %v657_v59 = vmul.f32 1.442695, %v632_v55  ;;  %v631_v60 = vmul.f32 0.5, %v2247_v56  ;;  %v720_v61 = vmul.f32 %v1881_v57, %v674_v43 }
 0x1b7   : > { %v1883_v62 = vpop.eup %1882  ;;  %v2251_v63 = vadd.f32 %v1758_v58, %v2204_v11  ;;  %v594_v0 = vpop.f32.mrf.mxu1 }
 0x1b8   : > { %v719_v1 = vmul.f32 %v1883_v62, %v672_v27  ;;  %1896 = vpow2.f32 %v657_v59  ;;  %v655_v2 = vmul.f32 1.442695, %v631_v60  ;;  %v2254_v3 = vadd.f32 %v2204_v11, %v594_v0  ;;  %753 = vrot.lane.b32.xlu1 %v720_v61, %s2041_s9  ;;  %v698_v59 = vpop.permute.xlu1 %697 }
 0x1b9   : > { %v1885_v5 = vpop.eup %1884  ;;  %v634_v6 = vmul.f32 0.5, %v2251_v63  ;;  %v1761_v7 = vpop.f32.mrf.mxu1 }
 0x1ba   : > { %1898 = vpow2.f32 %v655_v2  ;;  %v633_v9 = vmul.f32 0.5, %v2254_v3  ;;  %v722_v10 = vmul.f32 %v1885_v5, %v678_v35  ;;  %v2260_v12 = vadd.f32 %v1761_v7, %v2204_v11  ;;  %751 = vrot.lane.b32.xlu0 %v719_v1, %s2041_s9  ;;  %v688_v35 = vpop.permute.xlu0 %687 }
 0x1bb   : > { %v1887_v14 = vpop.eup %1886  ;;  %v661_v15 = vmul.f32 1.442695, %v634_v6  ;;  %v604_v17 = vpop.f32.mrf.mxu1 }
 0x1bc   : > { %v721_v18 = vmul.f32 %v1887_v14, %v2217_v21  ;;  %v659_v19 = vmul.f32 1.442695, %v633_v9  ;;  %v636_v22 = vmul.f32 0.5, %v2260_v12  ;;  %v2266_v23 = vadd.f32 %v2204_v11, %v604_v17  ;;  %757 = vrot.lane.b32.xlu1 %v722_v10, %s2041_s9  ;;  %v702_v6 = vpop.permute.xlu1 %701  ;;  %v208_v17 = vld [vmem:[%s2605_s2 + $0x71] sm:$0xff] }
 0x1bd   : > { %v1889_v24 = vpop.eup %1888  ;;  %1900 = vpow2.f32 %v661_v15  ;;  %v1764_v26 = vpop.f32.mrf.mxu1  ;;  %v209_v15 = vld [vmem:[%s2605_s2 + $0x79] sm:$0xff] }
 0x1be   : > { %1902 = vpow2.f32 %v659_v19  ;;  %v665_v27 = vmul.f32 1.442695, %v636_v22  ;;  %v635_v28 = vmul.f32 0.5, %v2266_v23  ;;  %v724_v29 = vmul.f32 %v1889_v24, %v682_v51  ;;  %755 = vrot.lane.b32.xlu0 %v721_v18, %s2041_s9  ;;  %1765 = vmatprep.subr.mxu0 %v209_v15  ;;  %v207_v22 = vld [vmem:[%s2605_s2 + $0x69] sm:$0xff] }
 0x1bf   : > { %v1891_v21 = vpop.eup %1890  ;;  %v2272_v32 = vadd.f32 %v1764_v26, %v2204_v11  ;;  %v614_v33 = vpop.f32.mrf.mxu1  ;;  %1766 = vmatpush3.msra.mxu0 %v209_v15  ;;  %v206_v26 = vld [vmem:[%s2605_s2 + $0x61] sm:$0xff] }
 0x1c0   : > { %1904 = vpow2.f32 %v665_v27  ;;  %v663_v38 = vmul.f32 1.442695, %v635_v28  ;;  %v723_v39 = vmul.f32 %v1891_v21, %v680_v53  ;;  %v2275_v40 = vadd.f32 %v2204_v11, %v614_v33  ;;  %761 = vrot.lane.b32.xlu1 %v724_v29, %s2041_s9  ;;  %v692_v53 = vpop.permute.xlu0 %691  ;;  %1767 = vmatprep.subr.mxu0 %v208_v17  ;;  %v205_v29 = vld [vmem:[%s2605_s2 + $0x59] sm:$0xff]  ;;  %v204_v21 = vld [vmem:[%s2605_s2 + $0x51] sm:$0xff] }
 0x1c1   : > { %v1893_v42 = vpop.eup %1892  ;;  %v638_v43 = vmul.f32 0.5, %v2272_v32  ;;  %1768 = vmatpush3.msra.mxu0 %v208_v17 }
 0x1c2   : > { %1906 = vpow2.f32 %v663_v38  ;;  %v637_v44 = vmul.f32 0.5, %v2275_v40  ;;  %v726_v45 = vmul.f32 %v1893_v42, %v686_v4  ;;  %759 = vrot.lane.b32.xlu0 %v723_v39, %s2041_s9  ;;  %1769 = vmatprep.subr.mxu0 %v207_v22  ;;  %v203_v39 = vld [vmem:[%s2605_s2 + $0x49] sm:$0xff] }
 0x1c3   : > { %v1895_v47 = vpop.eup %1894  ;;  %v669_v48 = vmul.f32 1.442695, %v638_v43  ;;  %1770 = vmatpush3.msra.mxu0 %v207_v22  ;;  %v202_v43 = vld [vmem:[%s2605_s2 + $0x41] sm:$0xff] }
 0x1c4   : > { %v667_v49 = vmul.f32 1.442695, %v637_v44  ;;  %v725_v51 = vmul.f32 %v1895_v47, %v684_v8  ;;  %765 = vrot.lane.b32.xlu1 %v726_v45, %s2041_s9  ;;  %v696_v62 = vpop.permute.xlu0 %695  ;;  %1771 = vmatprep.subr.mxu0 %v206_v26 }
 0x1c5   : > { %v1897_v11 = vpop.eup %1896  ;;  %1908 = vpow2.f32 %v669_v48  ;;  %1772 = vmatpush3.msra.mxu0 %v206_v26 }
 0x1c6   : > { %1910 = vpow2.f32 %v667_v49  ;;  %v728_v54 = vmul.f32 %v1897_v11, %v690_v31  ;;  %763 = vrot.lane.b32.xlu0 %v725_v51, %s2041_s9  ;;  %1773 = vmatprep.subr.mxu0 %v205_v29 }
 0x1c7   : > { %v1899_v55 = vpop.eup %1898  ;;  %1774 = vmatpush3.msra.mxu0 %v205_v29 }
 0x1c8   : > { %v727_v57 = vmul.f32 %v1899_v55, %v688_v35  ;;  %769 = vrot.lane.b32.xlu1 %v728_v54, %s2041_s9  ;;  %v700_v7 = vpop.permute.xlu0 %699  ;;  %1775 = vmatprep.subr.mxu0 %v204_v21 }
 0x1c9   : > { %1776 = vmatpush3.msra.mxu0 %v204_v21 }
 0x1ca   : > { %v1901_v58 = vpop.eup %1900  ;;  %767 = vrot.lane.b32.xlu0 %v727_v57, %s2041_s9  ;;  %1777 = vmatprep.subr.mxu0 %v203_v39 }
 0x1cb   : > { %v1903_v60 = vpop.eup %1902  ;;  %v730_v61 = vmul.f32 %v1901_v58, %v694_v52  ;;  %1778 = vmatpush3.msra.mxu0 %v203_v39 }
 0x1cc   : > { %v729_v0 = vmul.f32 %v1903_v60, %v692_v53  ;;  %1779 = vmatprep.subr.mxu0 %v202_v43 }
 0x1cd   : > { %v1905_v1 = vpop.eup %1904  ;;  %773 = vrot.lane.b32.xlu1 %v730_v61, %s2041_s9  ;;  %1780 = vmatpush3.msra.mxu0 %v202_v43 }
 0x1ce   : > { %v732_v2 = vmul.f32 %v1905_v1, %v698_v59  ;;  %771 = vrot.lane.b32.xlu0 %v729_v0, %s2041_s9 }
 0x1cf   : > { %v1907_v4 = vpop.eup %1906 }
 0x1d0   : > { %v731_v5 = vmul.f32 %v1907_v4, %v696_v62 }
 0x1d1   : > { %777 = vrot.lane.b32.xlu1 %v732_v2, %s2041_s9 }
 0x1d2   : > { %v1909_v8 = vpop.eup %1908  ;;  %775 = vrot.lane.b32.xlu0 %v731_v5, %s2041_s9 }
 0x1d3   : > { %v1911_v9 = vpop.eup %1910  ;;  %v734_v10 = vmul.f32 %v1909_v8, %v702_v6 }
 0x1d4   : > { %v733_v14 = vmul.f32 %v1911_v9, %v700_v7 }
 0x1d5   : > { %781 = vrot.lane.b32.xlu1 %v734_v10, %s2041_s9 }
 0x1d6   : > { %779 = vrot.lane.b32.xlu0 %v733_v14, %s2041_s9 }
 0x22a   : > { %v754_v18 = vpop.permute.xlu1 %753 }
 0x22b   : > { %v800_v19 = vadd.f32 %v754_v18, %v2207_v13 }
 0x22c   : > { %v752_v24 = vpop.permute.xlu0 %751 }
 0x22d   : > { %826 = vperm.xlu1 %1855, %v800_v19   ;;  %940 = vperm.xlu0 %1856, %v800_v19   ;;  %v799_v27 = vadd.f32 %v752_v24, %v2211_v16 }
 0x22e   : > { %v758_v28 = vpop.permute.xlu1 %757 }
 0x22f   : > { %v802_v33 = vadd.f32 %v758_v28, %v2215_v20 }
 0x230   : > { %v756_v31 = vpop.permute.xlu0 %755 }
 0x231   : > { %1858 = vset.pattern.permute.xlu1 %v2039_v36  ;;  %1857 = vset.pattern.permute.xlu0 %v2040_v37  ;;  %v801_v35 = vadd.f32 %v756_v31, %v2221_v25 }
 0x232   : > { %936 = vperm.xlu1 %1858, %v799_v27   ;;  %821 = vperm.xlu0 %1857, %v799_v27   ;;  %v762_v38 = vpop.permute.xlu1 %761 }
 0x233   : > { %v804_v42 = vadd.f32 %v762_v38, %v2225_v30 }
 0x234   : > { %v760_v44 = vpop.permute.xlu0 %759 }
 0x235   : > { %v803_v45 = vadd.f32 %v760_v44, %v2229_v34 }
 0x236   : > { %1859 = vset.pattern.permute.xlu1 %v2040_v37  ;;  %1862 = vset.pattern.permute.xlu0 %v2039_v36  ;;  %v766_v47 = vpop.permute.xlu1 %765 }
 0x237   : > { %836 = vperm.xlu1 %1859, %v802_v33   ;;  %944 = vperm.xlu0 %1862, %v801_v35   ;;  %v806_v55 = vadd.f32 %v766_v47, %v2235_v41 }
 0x238   : > { %v764_v48 = vpop.permute.xlu0 %763 }
 0x239   : > { %v805_v49 = vadd.f32 %v764_v48, %v2239_v46 }
 0x23a   : > { %v770_v51 = vpop.permute.xlu1 %769 }
 0x23b   : > { %1860 = vset.pattern.permute.xlu1 %v2039_v36  ;;  %956 = vperm.xlu0 %1862, %v804_v42   ;;  %v808_v52 = vadd.f32 %v770_v51, %v2243_v50 }
 0x23c   : > { %948 = vperm.xlu1 %1860, %v802_v33   ;;  %v768_v11 = vpop.permute.xlu0 %767 }
 0x23d   : > { %v807_v53 = vadd.f32 %v768_v11, %v2247_v56 }
 0x23f   : > { %1863 = vset.pattern.permute.xlu0 %v2040_v37  ;;  %v774_v54 = vpop.permute.xlu1 %773 }
 0x240   : > { %1861 = vset.pattern.permute.xlu1 %v2040_v37  ;;  %841 = vperm.xlu0 %1863, %v803_v45   ;;  %v772_v57 = vpop.permute.xlu0 %771  ;;  %v810_v2 = vadd.f32 %v774_v54, %v2251_v63 }
 0x241   : > { %831 = vperm.xlu1 %1861, %v801_v35   ;;  %v809_v58 = vadd.f32 %v772_v57, %v2254_v3 }
 0x243   : > { %v778_v59 = vpop.permute.xlu1 %777 }
 0x244   : > { %1868 = vset.pattern.permute.xlu0 %v2039_v36  ;;  %v812_v60 = vadd.f32 %v778_v59, %v2260_v12  ;;  %v776_v61 = vpop.permute.xlu0 %775 }
 0x245   : > { %846 = vperm.xlu1 %1861, %v804_v42   ;;  %960 = vperm.xlu0 %1868, %v805_v49   ;;  %v811_v62 = vadd.f32 %v776_v61, %v2266_v23 }
 0x248   : > { %v780_v0 = vpop.permute.xlu0 %779 }
 0x249   : > { %1864 = vset.pattern.permute.xlu1 %v2039_v36  ;;  %972 = vperm.xlu0 %1868, %v808_v52   ;;  %v813_v1 = vadd.f32 %v780_v0, %v2275_v40 }
 0x24a   : > { %952 = vperm.xlu1 %1864, %v803_v45  }
 0x24d   : > { %1869 = vset.pattern.permute.xlu0 %v2040_v37 }
 0x24e   : > { %1865 = vset.pattern.permute.xlu1 %v2040_v37  ;;  %861 = vperm.xlu0 %1869, %v807_v53  }
 0x24f   : > { %856 = vperm.xlu1 %1865, %v806_v55  }
 0x252   : > { %1874 = vset.pattern.permute.xlu0 %v2039_v36 }
 0x253   : > { %1866 = vset.pattern.permute.xlu1 %v2039_v36  ;;  %976 = vperm.xlu0 %1874, %v809_v58  }
 0x254   : > { %964 = vperm.xlu1 %1866, %v806_v55  }
 0x257   : > { %988 = vperm.xlu0 %1874, %v812_v60  }
 0x258   : > { %1867 = vset.pattern.permute.xlu1 %v2040_v37 }
 0x259   : > { %851 = vperm.xlu1 %1867, %v805_v49  }
 0x25b   : > { %1875 = vset.pattern.permute.xlu0 %v2040_v37 }
 0x25c   : > { %881 = vperm.xlu0 %1875, %v811_v62  }
 0x25d   : > { %866 = vperm.xlu1 %1867, %v808_v52  }
 0x260   : > { %1878 = vset.pattern.permute.xlu0 %v2039_v36 }
 0x261   : > { %1870 = vset.pattern.permute.xlu1 %v2039_v36  ;;  %992 = vperm.xlu0 %1878, %v813_v1  }
 0x262   : > { %968 = vperm.xlu1 %1870, %v807_v53  }
 0x265   : > { %1360 = vrot.lane.b32.xlu0 %v2211_v16, %s2042_s8  ;;  %v782_v16 = vpop.permute.xlu1 %781 }
 0x266   : > { %1871 = vset.pattern.permute.xlu1 %v2040_v37 }
 0x267   : > { %876 = vperm.xlu1 %1871, %v810_v2  }
 0x269   : > { %1364 = vrot.lane.b32.xlu0 %v2221_v25, %s2042_s8  ;;  %v814_v25 = vadd.f32 %v782_v16, %v2272_v32 }
 0x26b   : > { %1872 = vset.pattern.permute.xlu1 %v2039_v36 }
 0x26c   : > { %980 = vperm.xlu1 %1872, %v810_v2  }
 0x26d   : > { %1368 = vrot.lane.b32.xlu0 %v2229_v34, %s2042_s8  ;;  %v899_v34 = vlaneseq }
 0x270   : > { %1873 = vset.pattern.permute.xlu1 %v2040_v37 }
 0x271   : > { %871 = vperm.xlu1 %1873, %v809_v58   ;;  %1372 = vrot.lane.b32.xlu0 %v2239_v46, %s2042_s8 }
 0x275   : > { %886 = vperm.xlu1 %1873, %v812_v60   ;;  %1376 = vrot.lane.b32.xlu0 %v2247_v56, %s2042_s8  ;;  %v2395_v56 = vld [vmem:[%s2604_s1 + $0x13] ss:$0 sm:$0xff] }
 0x279   : > { %1876 = vset.pattern.permute.xlu1 %v2039_v36  ;;  %1380 = vrot.lane.b32.xlu0 %v2254_v3, %s2042_s8 }
 0x27a   : > { %984 = vperm.xlu1 %1876, %v811_v62  }
 0x27d   : > { %1384 = vrot.lane.b32.xlu0 %v2266_v23, %s2042_s8 }
 0x27e   : > { %1877 = vset.pattern.permute.xlu1 %v2040_v37  ;;  %v900_v37 = vshrl.u32 %v899_v34, 7 }
 0x27f   : > { %896 = vperm.xlu1 %1877, %v814_v25  }
 0x281   : > { %1388 = vrot.lane.b32.xlu0 %v2275_v40, %s2042_s8 }
 0x283   : > { %891 = vperm.xlu1 %1877, %v813_v1  }
 0x287   : > { %1879 = vset.pattern.permute.xlu1 %v2039_v36  ;;  %v901_v36 = vsub.s32 0, %v900_v37 }
 0x288   : > { %996 = vperm.xlu1 %1879, %v814_v25  }
 0x28c   : > { %1362 = vrot.lane.b32.xlu1 %v2207_v13, %s2042_s8  ;;  %v191_v13 = vld [vmem:[%s2604_s1 + $0x11] sm:$0x3] }
 0x290   : > { %1366 = vrot.lane.b32.xlu1 %v2215_v20, %s2042_s8  ;;  %v2387_v20 = vrot.slane %v191_v13, %v901_v36 }
 0x294   : > { %1370 = vrot.lane.b32.xlu1 %v2225_v30, %s2042_s8  ;;  %v1001_v30 = vsub.s32 1, %v900_v37 }
 0x298   : > { %1374 = vrot.lane.b32.xlu1 %v2235_v41, %s2042_s8 }
 0x29c   : > { %1378 = vrot.lane.b32.xlu1 %v2243_v50, %s2042_s8 }
 0x2a0   : > { %1382 = vrot.lane.b32.xlu1 %v2251_v63, %s2042_s8  ;;  %v2397_v63 = vrot.slane %v191_v13, %v1001_v30 }
 0x2a4   : > { %1386 = vrot.lane.b32.xlu1 %v2260_v12, %s2042_s8 }
 0x2a8   : > { %v827_v41 = vpop.permute.xlu1 %826  ;;  %1390 = vrot.lane.b32.xlu1 %v2272_v32, %s2042_s8  ;;  %v941_v46 = vpop.permute.xlu0 %940  ;;  %s1982_s8 = scalar_lea.vmem %s1981_s7, 4096 }
 0x2a9   : > { %v904_v50 = vmul.f32 %v2387_v20, %v827_v41  ;;  %v1004_v4 = vmul.f32 %v2397_v63, %v941_v46  ;;  %p1984_p1 = scmp.lt.s32.totalorder %s1982_s8, %s1976_s5 }
 0x2ab   : > { %v920_v3 = vadd.f32 %v2395_v56, %v904_v50  ;;  %p1985_p2 = por %p1984_p1, %p1983_p0 }
 0x2ad   : > { %v937_v12 = vpop.permute.xlu1 %936  ;;  %v822_v23 = vpop.permute.xlu0 %821  ;;  %v1020_v6 = vadd.f32 %v1004_v4, %v920_v3  ;;  %p1986_p3 = pnand %p1985_p2, %p1979_p13 }
 0x2ae   : > { %v903_v40 = vmul.f32 %v2387_v20, %v822_v23  ;;  %v1003_v32 = vmul.f32 %v2397_v63, %v937_v12 }
 0x2af   : > { %v1036_v14 = vmax.f32 %v1020_v6, 0.0 }
 0x2b0   : > { %v919_v5 = vadd.f32 %v2395_v56, %v903_v40 }
 0x2b2   : > { %v1019_v7 = vadd.f32 %v1003_v32, %v919_v5  ;;  %v837_v8 = vpop.permute.xlu1 %836  ;;  %v945_v9 = vpop.permute.xlu0 %944 }
 0x2b3   : > { %v906_v18 = vmul.f32 %v2387_v20, %v837_v8  ;;  %v1005_v27 = vmul.f32 %v2397_v63, %v945_v9 }
 0x2b4   : > { %v1035_v10 = vmax.f32 %v1019_v7, 0.0 }
 0x2b5   : > { %v922_v26 = vadd.f32 %v2395_v56, %v906_v18 }
 0x2b6   : > { %1781 = vmatprep.mubr.msk.f32.mxu0 %vm429_vm1, %v1035_v10  ;;  %v957_v17 = vpop.permute.xlu0 %956 }
 0x2b7   : > { %v949_v15 = vpop.permute.xlu1 %948  ;;  %1782 = vmatmul.mubr.msk.f32.vlgmr.msra.gmra.mxu0 %vm429_vm1, %v1036_v14  ;;  %v1008_v44 = vmul.f32 %v2397_v63, %v957_v17 }
 0x2b8   : > { %v1006_v19 = vmul.f32 %v2397_v63, %v949_v15 }
 0x2ba   : > { %v1022_v31 = vadd.f32 %v1006_v19, %v922_v26 }
 0x2bb   : > { %v842_v28 = vpop.permute.xlu0 %841 }
 0x2bc   : > { %v832_v22 = vpop.permute.xlu1 %831  ;;  %v907_v38 = vmul.f32 %v2387_v20, %v842_v28  ;;  %v1038_v43 = vmax.f32 %v1022_v31, 0.0 }
 0x2bd   : > { %v905_v24 = vmul.f32 %v2387_v20, %v832_v22 }
 0x2be   : > { %v923_v47 = vadd.f32 %v2395_v56, %v907_v38 }
 0x2bf   : > { %v921_v29 = vadd.f32 %v2395_v56, %v905_v24 }
 0x2c0   : > { %v847_v21 = vpop.permute.xlu1 %846  ;;  %v961_v54 = vpop.permute.xlu0 %960 }
 0x2c1   : > { %v1021_v33 = vadd.f32 %v1005_v27, %v921_v29  ;;  %v908_v35 = vmul.f32 %v2387_v20, %v847_v21  ;;  %v1009_v0 = vmul.f32 %v2397_v63, %v961_v54 }
 0x2c3   : > { %v1037_v39 = vmax.f32 %v1021_v33, 0.0  ;;  %v924_v42 = vadd.f32 %v2395_v56, %v908_v35 }
 0x2c4   : > { %v973_v57 = vpop.permute.xlu0 %972 }
 0x2c5   : > { %v953_v45 = vpop.permute.xlu1 %952  ;;  %1784 = vmatprep.mubr.msk.f32.mxu0 %vm429_vm1, %v1037_v39  ;;  %v1024_v49 = vadd.f32 %v1008_v44, %v924_v42  ;;  %v1012_v46 = vmul.f32 %v2397_v63, %v973_v57 }
 0x2c6   : > { %v1007_v48 = vmul.f32 %v2397_v63, %v953_v45  ;;  %1785 = vmatmul.mubr.msk.f32.gmra.mxu0 %vm429_vm1, %v1038_v43 }
 0x2c7   : > { %v1040_v53 = vmax.f32 %v1024_v49, 0.0 }
 0x2c8   : > { %v1023_v51 = vadd.f32 %v1007_v48, %v923_v47 }
 0x2c9   : > { %v862_v1 = vpop.permute.xlu0 %861 }
 0x2ca   : > { %v1039_v52 = vmax.f32 %v1023_v51, 0.0  ;;  %v857_v11 = vpop.permute.xlu1 %856  ;;  %v911_v36 = vmul.f32 %v2387_v20, %v862_v1 }
 0x2cb   : > { %v910_v58 = vmul.f32 %v2387_v20, %v857_v11 }
 0x2cc   : > { %1787 = vmatprep.mubr.msk.f32.mxu0 %vm429_vm1, %v1039_v52  ;;  %v927_v3 = vadd.f32 %v2395_v56, %v911_v36 }
 0x2cd   : > { %1788 = vmatmul.mubr.msk.f32.gmra.mxu0 %vm429_vm1, %v1040_v53  ;;  %v926_v62 = vadd.f32 %v2395_v56, %v910_v58 }
 0x2ce   : > { %v977_v5 = vpop.permute.xlu0 %976 }
 0x2cf   : > { %v965_v55 = vpop.permute.xlu1 %964  ;;  %v1013_v18 = vmul.f32 %v2397_v63, %v977_v5 }
 0x2d0   : > { %v1010_v59 = vmul.f32 %v2397_v63, %v965_v55 }
 0x2d2   : > { %v1026_v16 = vadd.f32 %v1010_v59, %v926_v62  ;;  %v989_v8 = vpop.permute.xlu0 %988 }
 0x2d3   : > { %v1016_v35 = vmul.f32 %v2397_v63, %v989_v8 }
 0x2d4   : > { %v852_v60 = vpop.permute.xlu1 %851  ;;  %v1042_v41 = vmax.f32 %v1026_v16, 0.0 }
 0x2d5   : > { %v909_v61 = vmul.f32 %v2387_v20, %v852_v60 }
 0x2d7   : > { %v925_v2 = vadd.f32 %v2395_v56, %v909_v61  ;;  %v882_v19 = vpop.permute.xlu0 %881 }
 0x2d8   : > { %v867_v25 = vpop.permute.xlu1 %866  ;;  %v915_v29 = vmul.f32 %v2387_v20, %v882_v19 }
 0x2d9   : > { %v1025_v34 = vadd.f32 %v1009_v0, %v925_v2  ;;  %v912_v37 = vmul.f32 %v2387_v20, %v867_v25 }
 0x2da   : > { %v931_v39 = vadd.f32 %v2395_v56, %v915_v29 }
 0x2db   : > { %v1041_v13 = vmax.f32 %v1025_v34, 0.0  ;;  %v928_v30 = vadd.f32 %v2395_v56, %v912_v37 }
 0x2dc   : > { %v993_v49 = vpop.permute.xlu0 %992 }
 0x2dd   : > { %v969_v50 = vpop.permute.xlu1 %968  ;;  %1790 = vmatprep.mubr.msk.f32.mxu0 %vm429_vm1, %v1041_v13  ;;  %v1028_v23 = vadd.f32 %v1012_v46, %v928_v30  ;;  %v1017_v53 = vmul.f32 %v2397_v63, %v993_v49 }
 0x2de   : > { %v1011_v12 = vmul.f32 %v2397_v63, %v969_v50  ;;  %1791 = vmatmul.mubr.msk.f32.gmra.mxu0 %vm429_vm1, %v1042_v41 }
 0x2df   : > { %v1044_v6 = vmax.f32 %v1028_v23, 0.0 }
 0x2e0   : > { %v1027_v40 = vadd.f32 %v1011_v12, %v927_v3 }
 0x2e2   : > { %v1043_v4 = vmax.f32 %v1027_v40, 0.0  ;;  %v877_v32 = vpop.permute.xlu1 %876 }
 0x2e3   : > { %v914_v9 = vmul.f32 %v2387_v20, %v877_v32 }
 0x2e4   : > { %1793 = vmatprep.mubr.msk.f32.mxu0 %vm429_vm1, %v1043_v4 }
 0x2e5   : > { %1794 = vmatmul.mubr.msk.f32.gmra.mxu0 %vm429_vm1, %v1044_v6  ;;  %v930_v17 = vadd.f32 %v2395_v56, %v914_v9 }
 0x2e7   : > { %v981_v7 = vpop.permute.xlu1 %980 }
 0x2e8   : > { %v1014_v10 = vmul.f32 %v2397_v63, %v981_v7 }
 0x2ea   : > { %v1030_v24 = vadd.f32 %v1014_v10, %v930_v17  ;;  %v1361_v17 = vpop.permute.xlu0 %1360 }
 0x2ec   : > { %v872_v14 = vpop.permute.xlu1 %871  ;;  %v1046_v33 = vmax.f32 %v1030_v24, 0.0 }
 0x2ed   : > { %v913_v15 = vmul.f32 %v2387_v20, %v872_v14 }
 0x2ef   : > { %v929_v22 = vadd.f32 %v2395_v56, %v913_v15 }
 0x2f0   : > { %v887_v26 = vpop.permute.xlu1 %886 }
 0x2f1   : > { %v1029_v27 = vadd.f32 %v1013_v18, %v929_v22  ;;  %v916_v28 = vmul.f32 %v2387_v20, %v887_v26 }
 0x2f3   : > { %v1045_v31 = vmax.f32 %v1029_v27, 0.0  ;;  %v932_v21 = vadd.f32 %v2395_v56, %v916_v28 }
 0x2f5   : > { %v985_v38 = vpop.permute.xlu1 %984  ;;  %1796 = vmatprep.mubr.msk.f32.mxu0 %vm429_vm1, %v1045_v31  ;;  %v1032_v43 = vadd.f32 %v1016_v35, %v932_v21 }
 0x2f6   : > { %v1015_v42 = vmul.f32 %v2397_v63, %v985_v38  ;;  %1797 = vmatmul.mubr.msk.f32.gmra.mxu0 %vm429_vm1, %v1046_v33 }
 0x2f7   : > { %v1048_v48 = vmax.f32 %v1032_v43, 0.0 }
 0x2f8   : > { %v1031_v44 = vadd.f32 %v1015_v42, %v931_v39 }
 0x2fa   : > { %v1047_v45 = vmax.f32 %v1031_v44, 0.0  ;;  %v897_v47 = vpop.permute.xlu1 %896 }
 0x2fb   : > { %v918_v11 = vmul.f32 %v2387_v20, %v897_v47 }
 0x2fc   : > { %1799 = vmatprep.mubr.msk.f32.mxu0 %vm429_vm1, %v1047_v45 }
 0x2fd   : > { %1800 = vmatmul.mubr.msk.f32.gmra.mxu0 %vm429_vm1, %v1048_v48  ;;  %v934_v58 = vadd.f32 %v2395_v56, %v918_v11 }
 0x2fe   : > { %v892_v51 = vpop.permute.xlu1 %891 }
 0x2ff   : > { %v917_v52 = vmul.f32 %v2387_v20, %v892_v51  ;;  %v2465_v20 = vld [vmem:[%s2605_s2 + $0x81] ss:$0 sm:$0xff] }
 0x301   : > { %v933_v54 = vadd.f32 %v2395_v56, %v917_v52 }
 0x303   : > { %v1033_v55 = vadd.f32 %v1017_v53, %v933_v54  ;;  %v997_v57 = vpop.permute.xlu1 %996  ;;  %v1365_v54 = vpop.permute.xlu0 %1364 }
 0x304   : > { %v1018_v59 = vmul.f32 %v2397_v63, %v997_v57 }
 0x305   : > { %v1049_v60 = vmax.f32 %v1033_v55, 0.0 }
 0x306   : > { %v1034_v61 = vadd.f32 %v1018_v59, %v934_v58 }
 0x307   : > { %1802 = vmatprep.mubr.msk.f32.mxu0 %vm429_vm1, %v1049_v60  ;;  %v1363_v8 = vpop.permute.xlu1 %1362 }
 0x308   : > { %v1050_v62 = vmax.f32 %v1034_v61, 0.0 }
 0x30a   : > { %1803 = vmatmul.mubr.msk.f32.gmra.mxu0 %vm429_vm1, %v1050_v62 }
 0x30b   : > { %v1367_v49 = vpop.permute.xlu1 %1366 }
 0x377   : > { %v1783_v0 = vpop.f32.mrf.mxu0 }
 0x378   : > { %v1175_v1 = vadd.f32 %v1783_v0, %v2465_v20  ;;  %v1371_v0 = vpop.permute.xlu1 %1370 }
 0x379   : > { %v1169_v2 = vpop.f32.mrf.mxu0 }
 0x37a   : > { %v1610_v16 = vmul.f32 -1.442695, %v1175_v1  ;;  %v1170_v56 = vadd.f32 %v2465_v20, %v1169_v2 }
 0x37c   : > { %1912 = vpow2.f32 %v1610_v16  ;;  %v1609_v63 = vmul.f32 -1.442695, %v1170_v56  ;;  %v1369_v56 = vpop.permute.xlu0 %1368 }
 0x37e   : > { %1914 = vpow2.f32 %v1609_v63 }
 0x386   : > { %v1786_v25 = vpop.f32.mrf.mxu0 }
 0x387   : > { %v1185_v34 = vadd.f32 %v1786_v25, %v2465_v20 }
 0x388   : > { %v1179_v37 = vpop.f32.mrf.mxu0 }
 0x389   : > { %v1913_v36 = vpop.eup %1912  ;;  %v1612_v13 = vmul.f32 -1.442695, %v1185_v34  ;;  %v1180_v30 = vadd.f32 %v2465_v20, %v1179_v37 }
 0x38a   : > { %v1297_v41 = vadd.f32 1.0, %v1913_v36 }
 0x38b   : > { %v1915_v46 = vpop.eup %1914  ;;  %1916 = vpow2.f32 %v1612_v13  ;;  %v1611_v50 = vmul.f32 -1.442695, %v1180_v30 }
 0x38c   : > { %1918 = vrcp.f32 %v1297_v41  ;;  %v1296_v3 = vadd.f32 1.0, %v1915_v46 }
 0x38d   : > { %1920 = vpow2.f32 %v1611_v50  ;;  %v1789_v12 = vpop.f32.mrf.mxu0 }
 0x38e   : > { %1922 = vrcp.f32 %v1296_v3  ;;  %v1195_v23 = vadd.f32 %v1789_v12, %v2465_v20 }
 0x38f   : > { %v1189_v40 = vpop.f32.mrf.mxu0 }
 0x390   : > { %v1614_v4 = vmul.f32 -1.442695, %v1195_v23  ;;  %v1190_v32 = vadd.f32 %v2465_v20, %v1189_v40 }
 0x392   : > { %1924 = vpow2.f32 %v1614_v4  ;;  %v1613_v5 = vmul.f32 -1.442695, %v1190_v32 }
 0x394   : > { %1926 = vpow2.f32 %v1613_v5 }
 0x398   : > { %v1917_v6 = vpop.eup %1916 }
 0x399   : > { %v1919_v7 = vpop.eup %1918  ;;  %v1299_v9 = vadd.f32 1.0, %v1917_v6 }
 0x39a   : > { %v1921_v10 = vpop.eup %1920  ;;  %v1409_v14 = vsel %vm215_vm0, %v1919_v7, %v1363_v8 }
 0x39b   : > { %v1923_v15 = vpop.eup %1922  ;;  %v1426_v18 = vsel %vm1424_vm2, %v1409_v14, %v1363_v8  ;;  %1928 = vrcp.f32 %v1299_v9  ;;  %v1298_v19 = vadd.f32 1.0, %v1921_v10  ;;  %v1375_v14 = vpop.permute.xlu1 %1374 }
 0x39c   : > { %v1443_v22 = vsel %vm1441_vm3, %v1426_v18, 0.0  ;;  %v1408_v24 = vsel %vm215_vm0, %v1923_v15, %v1361_v17 }
 0x39d   : > { %1459 = vst [vmem:[%s2480_s26 + $0x8] sm:$0xff] %v1443_v22  ;;  %v1425_v26 = vsel %vm1424_vm2, %v1408_v24, %v1361_v17  ;;  %1930 = vrcp.f32 %v1298_v19  ;;  %v1373_v22 = vpop.permute.xlu0 %1372 }
 0x39e   : > { %v1442_v27 = vsel %vm1441_vm3, %v1425_v26, 0.0  ;;  %v1792_v28 = vpop.f32.mrf.mxu0 }
 0x39f   : > { %v1925_v29 = vpop.eup %1924  ;;  %1458 = vst [vmem:[%s2480_s26] sm:$0xff] %v1442_v27  ;;  %v1205_v31 = vadd.f32 %v1792_v28, %v2465_v20 }
 0x3a0   : > { %v1301_v21 = vadd.f32 1.0, %v1925_v29  ;;  %v1199_v33 = vpop.f32.mrf.mxu0 }
 0x3a1   : > { %v1927_v35 = vpop.eup %1926  ;;  %v1616_v38 = vmul.f32 -1.442695, %v1205_v31  ;;  %v1200_v39 = vadd.f32 %v2465_v20, %v1199_v33  ;;  %v1379_v33 = vpop.permute.xlu1 %1378 }
 0x3a2   : > { %1932 = vrcp.f32 %v1301_v21  ;;  %v1300_v42 = vadd.f32 1.0, %v1927_v35 }
 0x3a3   : > { %1934 = vpow2.f32 %v1616_v38  ;;  %v1615_v43 = vmul.f32 -1.442695, %v1200_v39 }
 0x3a4   : > { %1936 = vrcp.f32 %v1300_v42  ;;  %v1377_v42 = vpop.permute.xlu0 %1376 }
 0x3a5   : > { %1938 = vpow2.f32 %v1615_v43  ;;  %v1795_v44 = vpop.f32.mrf.mxu0 }
 0x3a6   : > { %v1215_v45 = vadd.f32 %v1795_v44, %v2465_v20 }
 0x3a7   : > { %v1209_v47 = vpop.f32.mrf.mxu0 }
 0x3a8   : > { %v1929_v48 = vpop.eup %1928  ;;  %v1618_v51 = vmul.f32 -1.442695, %v1215_v45  ;;  %v1210_v52 = vadd.f32 %v2465_v20, %v1209_v47 }
 0x3a9   : > { %v1411_v11 = vsel %vm215_vm0, %v1929_v48, %v1367_v49 }
 0x3aa   : > { %v1931_v53 = vpop.eup %1930  ;;  %v1428_v55 = vsel %vm1424_vm2, %v1411_v11, %v1367_v49  ;;  %1940 = vpow2.f32 %v1618_v51  ;;  %v1617_v57 = vmul.f32 -1.442695, %v1210_v52 }
 0x3ab   : > { %v1445_v58 = vsel %vm1441_vm3, %v1428_v55, 0.0  ;;  %v1410_v59 = vsel %vm215_vm0, %v1931_v53, %v1365_v54 }
 0x3ac   : > { %1461 = vst [vmem:[%s2480_s26 + $0x18] sm:$0xff] %v1445_v58  ;;  %v1427_v60 = vsel %vm1424_vm2, %v1410_v59, %v1365_v54  ;;  %1942 = vpow2.f32 %v1617_v57 }
 0x3ad   : > { %v1444_v61 = vsel %vm1441_vm3, %v1427_v60, 0.0 }
 0x3ae   : > { %1460 = vst [vmem:[%s2480_s26 + $0x10] sm:$0xff] %v1444_v61 }
 0x3af   : > { %v1933_v62 = vpop.eup %1932 }
 0x3b0   : > { %v1935_v1 = vpop.eup %1934  ;;  %v1413_v2 = vsel %vm215_vm0, %v1933_v62, %v1371_v0 }
 0x3b1   : > { %v1937_v16 = vpop.eup %1936  ;;  %v1430_v63 = vsel %vm1424_vm2, %v1413_v2, %v1371_v0  ;;  %v1303_v25 = vadd.f32 1.0, %v1935_v1  ;;  %v1383_v1 = vpop.permute.xlu1 %1382 }
 0x3b2   : > { %v1939_v34 = vpop.eup %1938  ;;  %v1447_v37 = vsel %vm1441_vm3, %v1430_v63, 0.0  ;;  %v1412_v36 = vsel %vm215_vm0, %v1937_v16, %v1369_v56 }
 0x3b3   : > { %1463 = vst [vmem:[%s2480_s26 + $0x28] sm:$0xff] %v1447_v37  ;;  %v1429_v13 = vsel %vm1424_vm2, %v1412_v36, %v1369_v56  ;;  %1944 = vrcp.f32 %v1303_v25  ;;  %v1302_v30 = vadd.f32 1.0, %v1939_v34  ;;  %v1381_v56 = vpop.permute.xlu0 %1380 }
 0x3b4   : > { %v1446_v41 = vsel %vm1441_vm3, %v1429_v13, 0.0 }
 0x3b5   : > { %1462 = vst [vmem:[%s2480_s26 + $0x20] sm:$0xff] %v1446_v41  ;;  %1946 = vrcp.f32 %v1302_v30 }
 0x3b6   : > { %v1798_v46 = vpop.f32.mrf.mxu0 }
 0x3b7   : > { %v1941_v50 = vpop.eup %1940  ;;  %v1225_v3 = vadd.f32 %v1798_v46, %v2465_v20  ;;  %v1387_v46 = vpop.permute.xlu1 %1386 }
 0x3b8   : > { %v1305_v12 = vadd.f32 1.0, %v1941_v50  ;;  %v1219_v23 = vpop.f32.mrf.mxu0 }
 0x3b9   : > { %v1943_v40 = vpop.eup %1942  ;;  %v1620_v4 = vmul.f32 -1.442695, %v1225_v3  ;;  %v1220_v32 = vadd.f32 %v2465_v20, %v1219_v23  ;;  %v1385_v23 = vpop.permute.xlu0 %1384 }
 0x3ba   : > { %1948 = vrcp.f32 %v1305_v12  ;;  %v1304_v5 = vadd.f32 1.0, %v1943_v40 }
 0x3bb   : > { %1950 = vpow2.f32 %v1620_v4  ;;  %v1619_v6 = vmul.f32 -1.442695, %v1220_v32 }
 0x3bc   : > { %1952 = vrcp.f32 %v1304_v5 }
 0x3bd   : > { %1954 = vpow2.f32 %v1619_v6  ;;  %v1801_v7 = vpop.f32.mrf.mxu0 }
 0x3be   : > { %v1235_v8 = vadd.f32 %v1801_v7, %v2465_v20 }
 0x3bf   : > { %v1229_v9 = vpop.f32.mrf.mxu0 }
 0x3c0   : > { %v1945_v10 = vpop.eup %1944  ;;  %v1622_v15 = vmul.f32 -1.442695, %v1235_v8  ;;  %v1230_v17 = vadd.f32 %v2465_v20, %v1229_v9  ;;  %v1391_v8 = vpop.permute.xlu1 %1390 }
 0x3c1   : > { %v1415_v18 = vsel %vm215_vm0, %v1945_v10, %v1375_v14 }
 0x3c2   : > { %v1947_v19 = vpop.eup %1946  ;;  %v1432_v24 = vsel %vm1424_vm2, %v1415_v18, %v1375_v14  ;;  %1956 = vpow2.f32 %v1622_v15  ;;  %v1621_v26 = vmul.f32 -1.442695, %v1230_v17  ;;  %v1389_v14 = vpop.permute.xlu0 %1388 }
 0x3c3   : > { %v1449_v27 = vsel %vm1441_vm3, %v1432_v24, 0.0  ;;  %v1414_v28 = vsel %vm215_vm0, %v1947_v19, %v1373_v22 }
 0x3c4   : > { %1465 = vst [vmem:[%s2480_s26 + $0x38] sm:$0xff] %v1449_v27  ;;  %v1431_v29 = vsel %vm1424_vm2, %v1414_v28, %v1373_v22  ;;  %1958 = vpow2.f32 %v1621_v26 }
 0x3c5   : > { %v1448_v31 = vsel %vm1441_vm3, %v1431_v29, 0.0 }
 0x3c6   : > { %1464 = vst [vmem:[%s2480_s26 + $0x30] sm:$0xff] %v1448_v31 }
 0x3c7   : > { %v1949_v21 = vpop.eup %1948 }
 0x3c8   : > { %v1951_v35 = vpop.eup %1950  ;;  %v1417_v38 = vsel %vm215_vm0, %v1949_v21, %v1379_v33 }
 0x3c9   : > { %v1953_v39 = vpop.eup %1952  ;;  %v1434_v43 = vsel %vm1424_vm2, %v1417_v38, %v1379_v33  ;;  %v1307_v44 = vadd.f32 1.0, %v1951_v35 }
 0x3ca   : > { %v1955_v45 = vpop.eup %1954  ;;  %v1451_v47 = vsel %vm1441_vm3, %v1434_v43, 0.0  ;;  %v1416_v48 = vsel %vm215_vm0, %v1953_v39, %v1377_v42  ;;  %v1804_v49 = vpop.f32.mrf.mxu0 }
 0x3cb   : > { %1467 = vst [vmem:[%s2480_s26 + $0x48] sm:$0xff] %v1451_v47  ;;  %v1433_v51 = vsel %vm1424_vm2, %v1416_v48, %v1377_v42  ;;  %1960 = vrcp.f32 %v1307_v44  ;;  %v1306_v52 = vadd.f32 1.0, %v1955_v45  ;;  %v1245_v11 = vadd.f32 %v1804_v49, %v2465_v20 }
 0x3cc   : > { %v1450_v53 = vsel %vm1441_vm3, %v1433_v51, 0.0  ;;  %v1239_v54 = vpop.f32.mrf.mxu0 }
 0x3cd   : > { %1466 = vst [vmem:[%s2480_s26 + $0x40] sm:$0xff] %v1450_v53  ;;  %1962 = vrcp.f32 %v1306_v52  ;;  %v1624_v55 = vmul.f32 -1.442695, %v1245_v11  ;;  %v1240_v57 = vadd.f32 %v2465_v20, %v1239_v54 }
 0x3cf   : > { %v1957_v58 = vpop.eup %1956  ;;  %1964 = vpow2.f32 %v1624_v55  ;;  %v1623_v59 = vmul.f32 -1.442695, %v1240_v57 }
 0x3d0   : > { %v1309_v60 = vadd.f32 1.0, %v1957_v58 }
 0x3d1   : > { %v1959_v61 = vpop.eup %1958  ;;  %1966 = vpow2.f32 %v1623_v59 }
 0x3d2   : > { %1968 = vrcp.f32 %v1309_v60  ;;  %v1308_v62 = vadd.f32 1.0, %v1959_v61 }
 0x3d4   : > { %1970 = vrcp.f32 %v1308_v62 }
 0x3d8   : > { %v1961_v0 = vpop.eup %1960 }
 0x3d9   : > { %v1419_v2 = vsel %vm215_vm0, %v1961_v0, %v1383_v1 }
 0x3da   : > { %v1963_v16 = vpop.eup %1962  ;;  %v1436_v63 = vsel %vm1424_vm2, %v1419_v2, %v1383_v1 }
 0x3db   : > { %v1453_v20 = vsel %vm1441_vm3, %v1436_v63, 0.0  ;;  %v1418_v25 = vsel %vm215_vm0, %v1963_v16, %v1381_v56 }
 0x3dc   : > { %v1965_v34 = vpop.eup %1964  ;;  %1469 = vst [vmem:[%s2480_s26 + $0x58] sm:$0xff] %v1453_v20  ;;  %v1435_v37 = vsel %vm1424_vm2, %v1418_v25, %v1381_v56 }
 0x3dd   : > { %v1452_v36 = vsel %vm1441_vm3, %v1435_v37, 0.0  ;;  %v1311_v13 = vadd.f32 1.0, %v1965_v34 }
 0x3de   : > { %v1967_v30 = vpop.eup %1966  ;;  %1468 = vst [vmem:[%s2480_s26 + $0x50] sm:$0xff] %v1452_v36 }
 0x3df   : > { %v1969_v41 = vpop.eup %1968  ;;  %1972 = vrcp.f32 %v1311_v13  ;;  %v1310_v50 = vadd.f32 1.0, %v1967_v30 }
 0x3e0   : > { %v1421_v3 = vsel %vm215_vm0, %v1969_v41, %v1387_v46 }
 0x3e1   : > { %v1971_v12 = vpop.eup %1970  ;;  %v1438_v40 = vsel %vm1424_vm2, %v1421_v3, %v1387_v46  ;;  %1974 = vrcp.f32 %v1310_v50 }
 0x3e2   : > { %v1455_v4 = vsel %vm1441_vm3, %v1438_v40, 0.0  ;;  %v1420_v32 = vsel %vm215_vm0, %v1971_v12, %v1385_v23 }
 0x3e3   : > { %1471 = vst [vmem:[%s2480_s26 + $0x68] sm:$0xff] %v1455_v4  ;;  %v1437_v5 = vsel %vm1424_vm2, %v1420_v32, %v1385_v23 }
 0x3e4   : > { %v1454_v6 = vsel %vm1441_vm3, %v1437_v5, 0.0 }
 0x3e5   : > { %1470 = vst [vmem:[%s2480_s26 + $0x60] sm:$0xff] %v1454_v6 }
 0x3ec   : > { %v1973_v7 = vpop.eup %1972 }
 0x3ed   : > { %v1423_v9 = vsel %vm215_vm0, %v1973_v7, %v1391_v8 }
 0x3ee   : > { %v1975_v10 = vpop.eup %1974  ;;  %v1440_v15 = vsel %vm1424_vm2, %v1423_v9, %v1391_v8 }
 0x3ef   : > { %v1457_v17 = vsel %vm1441_vm3, %v1440_v15, 0.0  ;;  %v1422_v18 = vsel %vm215_vm0, %v1975_v10, %v1389_v14 }
 0x3f0   : > { %1473 = vst [vmem:[%s2480_s26 + $0x78] sm:$0xff] %v1457_v17  ;;  %v1439_v19 = vsel %vm1424_vm2, %v1422_v18, %v1389_v14 }
 0x3f1   : > { %v1456_v22 = vsel %vm1441_vm3, %v1439_v19, 0.0 }
 0x3f2   : > { %1472 = vst [vmem:[%s2480_s26 + $0x70] sm:$0xff] %v1456_v22 }
 0x3f3   : > { %1989 = shalt.err (!%p1986_p3)
}
 0x3f4   : > { %s1990_s9 = scalar_lea.hbm %s2553_s4, 2048  ;;  %s1994_s17 = scalar_lea.hbm %s2606_s3, 4096 }
 0x3f5   : > { %p1991_p4 = scmp.ne.s32.totalorder %s2553_s4, %s1990_s9  ;;  %p1995_p9 = scmp.lt.s32.totalorder %s2553_s4, %s2606_s3 }
 0x3f6   : > { %p1996_p10 = scmp.lt.s32.totalorder %s1994_s17, %s1990_s9 }
 0x3f7   : > { %p1992_p7 = pnand %p1991_p4, %p2104_p5 }
 0x3f8   : > { %p1997_p11 = por %p1996_p10, %p1995_p9 }
 0x3f9   : > { %p1993_p8 = pneg %p1992_p7 }
 0x3fb   : > { %p1998_p12 = pnand %p1997_p11, %p1993_p8 }
 0x3fd   : > { %2001 = shalt.err (!%p1998_p12)
}
 0x3fe   : > { %s2044_s24 = smov 128   ;;  %s2045_s25 = smov 8  }
 0x3ff   : > { %1809 = dma.vmem_to_hbm [thread:$0]  (%p2104_p5), %s2555_s28, 2048, %s2553_s4, %s2563_s16, %s2044_s24, %s2044_s24, %s2045_s25  }
 0x400 PF: > { %p1815_p13 = scmp.ge.s32.totalorder %s2036_s15, 2  ;;  %s1503_s26 = sand.u32 1, %s2024_s12  }
 0x401   : > { %s1504_s27 = scalar_lea.sflag [#allocation3], %s1503_s26 }
 0x402   : > { %p1812_p0 = pnand %p1815_p13, %p2108_p6 }
 0x404   : > { %p1813_p1 = pneg %p1812_p0 }
 0x406   : > { %2019 = dma.done.wait (%p1813_p1), %s1504_s27, 2048  }
 0x407   : > { %2021 = vsyncadd (%p1813_p1), %s1504_s27, 4294965248  ;;  %p13_p2 = scmp.ge.s32.totalorder %s2091_s18, 4   ;;  %s2609_s12 = smov %s2028_s13 }
 0x408   : > { %s2610_s13 = smov %s2032_s14  ;;  %s2611_s14 = smov %s2102_s21 }
 0x409   : > { %s2612_s15 = smov %s2091_s18  ;;  %15 = sbr.rel (!%p13_p2) target bundleno = 3 (0x3), region = 67 }
 0x40e   :  { %1509 = vsyncpa [#allocation3], 1 }
 0x40f   :  { %1511 = vsyncpa [#allocation3 + $0x1], 1 }

</bundles_post_ra>
